<compile_context>
chip_gen: v7x
topology: tpu7x:2x2x1
jax: 0.10.0
libtpu: 0.0.40
codegen_flags: <defaults>
</compile_context>

<pallas_src>
import functools
import math

import jax
import jax.numpy as jnp
from jax import lax
from jax.experimental import pallas as pl
from jax.experimental.pallas import tpu as pltpu


# ----------------------------------------------------------------------------
# Kernel: fused 3x3 average pool (stride s, pad 1) + 1x1 conv for one row tile
# ----------------------------------------------------------------------------

def _identity_d_kernel(*refs, stride, th, wo, cin, n_row_tiles):
    # Input view (built for free in the wrapper):
    #   x_view[n, oy, py, ox, px*Cin + c] == x_nhwc[n, oy*s + py, ox*s + px, c]
    # Per grid step (n, t) we get:
    #   xm_ref : (th, s, Wo, s*Cin)  main rows  oy in [t*th, t*th+th)
    #   xt_ref : (1, Wo, s*Cin)      top halo row (input row s*t*th - 1)
    #   xb_ref : (1, Wo, s*Cin)      bottom halo row (stride 1 only)
    #   w_ref  : (s*Cin, Cout)       (w/9), tiled over W-phases for s == 2
    #   b_ref  : (1, Cout)
    #   o_ref  : (th*Wo, Cout)
    s = stride
    if s == 1:
        xm_ref, xt_ref, xb_ref, w_ref, b_ref, o_ref = refs
    else:
        xm_ref, xt_ref, w_ref, b_ref, o_ref = refs

    t = pl.program_id(1)
    f32 = jnp.float32

    # ---- vertical (H) 3-tap sum: major-axis ref slices + concat (cheap) ----
    if s == 1:
        xc = xm_ref[:, 0].astype(f32)                          # (th, Wo, Cin)
        top = jnp.where(t == 0, 0.0, xt_ref[...].astype(f32))  # (1, Wo, Cin)
        bot = jnp.where(t == n_row_tiles - 1, 0.0, xb_ref[...].astype(f32))
        prev_rows = top if th == 1 else jnp.concatenate([top, xc[:-1]], axis=0)
        next_rows = bot if th == 1 else jnp.concatenate([xc[1:], bot], axis=0)
        vsum = (prev_rows + next_rows) + xc                    # rows oy-1,oy,oy+1
    else:  # s == 2
        xe = xm_ref[:, 0].astype(f32)                          # rows 2*oy     (th, Wo, 2*Cin)
        xo = xm_ref[:, 1].astype(f32)                          # rows 2*oy + 1
        top = jnp.where(t == 0, 0.0, xt_ref[...].astype(f32))  # row 2*t*th - 1
        prev_rows = top if th == 1 else jnp.concatenate([top, xo[:-1]], axis=0)
        vsum = (xe + xo) + prev_rows                           # rows 2oy-1,2oy,2oy+1

    # ---- horizontal (W) 3-tap sum ------------------------------------------
    ox_idx = lax.broadcasted_iota(jnp.int32, vsum.shape, 1)
    if s == 1:
        left = jnp.where(ox_idx == 0, 0.0, pltpu.roll(vsum, 1, 1))
        right = jnp.where(ox_idx == wo - 1, 0.0, pltpu.roll(vsum, wo - 1, 1))
        lhs = (left + right) + vsum                            # (th, Wo, Cin), K = Cin
    else:
        # Lanes are [phase0 | phase1].  Taps: col 2ox (phase0, as-is),
        # col 2ox+1 (phase1, as-is), col 2ox-1 (phase1 of ox-1, zero at ox=0).
        # The phase0+phase1 reduction happens inside the matmul (weight tiled),
        # so only the shifted tap needs a VPU add here.
        lane_idx = lax.broadcasted_iota(jnp.int32, vsum.shape, 2)
        shifted = pltpu.roll(vsum, 1, 1)                       # ox -> ox-1
        left = jnp.where((ox_idx > 0) & (lane_idx >= cin), shifted, 0.0)
        lhs = vsum + left                                      # (th, Wo, 2*Cin), K = 2*Cin

    # ---- 1x1 conv: single MXU contraction, bias fused, lane-dense store ----
    k = lhs.shape[-1]
    lhs2 = lhs.reshape(th * wo, k).astype(jnp.bfloat16)
    y = jnp.dot(lhs2, w_ref[...], preferred_element_type=jnp.float32)
    o_ref[...] = (y + b_ref[...]).astype(o_ref.dtype)


# ----------------------------------------------------------------------------
# Wrappers
# ----------------------------------------------------------------------------

def _pick_row_tile(ho, wo):
    """Largest divisor of ho giving >=2 row tiles (pipelining / megacore),
    keeping th*wo a multiple of 8 so the output block tiles cleanly."""
    for cand in range(min(ho // 2, 64), 0, -1):
        if ho % cand == 0 and (cand * wo) % 8 == 0:
            return cand
    return ho


def identity_d_forward_nhwc(x_nhwc, w, b, stride):
    """Fused AvgPool(3,s,1)+Conv1x1 on an NHWC activation -> (N, Ho, Wo, Cout) f32."""
    N, H, W, Cin = x_nhwc.shape
    Cout = w.shape[1]
    s = int(stride)
    assert s in (1, 2), "supported strides: 1, 2"
    assert H % s == 0 and W % s == 0
    Ho, Wo = H // s, W // s
    th = _pick_row_tile(Ho, Wo)
    n_row_tiles = Ho // th

    # Free (metadata-only) phase view of the contiguous bf16 NHWC array.
    x_view = x_nhwc.astype(jnp.bfloat16).reshape(N, Ho, s, Wo, s * Cin)

    # Fold the 1/9 divisor (and, for s=2, the W-phase reduction) into the weight.
    w_mx = jnp.tile(w.astype(jnp.float32) * (1.0 / 9.0), (s, 1)).astype(jnp.bfloat16)
    b2d = b.reshape(1, Cout).astype(jnp.float32)

    halo_block = (None, 1, None, Wo, s * Cin)
    in_specs = [
        pl.BlockSpec((None, th, s, Wo, s * Cin), lambda n, t: (n, t, 0, 0, 0)),
        pl.BlockSpec(halo_block,
                     lambda n, t: (n, jnp.maximum(t * th - 1, 0), s - 1, 0, 0)),
    ]
    operands = [x_view, x_view]
    if s == 1:
        in_specs.append(
            pl.BlockSpec(halo_block,
                         lambda n, t: (n, jnp.minimum(t * th + th, Ho - 1), 0, 0, 0)))
        operands.append(x_view)
    in_specs += [
        pl.BlockSpec((s * Cin, Cout), lambda n, t: (0, 0)),
        pl.BlockSpec((1, Cout), lambda n, t: (0, 0)),
    ]
    operands += [w_mx, b2d]

    kernel = functools.partial(_identity_d_kernel, stride=s, th=th, wo=Wo,
                               cin=Cin, n_row_tiles=n_row_tiles)
    out = pl.pallas_call(
        kernel,
        out_shape=jax.ShapeDtypeStruct((N, Ho * Wo, Cout), jnp.float32),
        grid=(N, n_row_tiles),
        in_specs=in_specs,
        out_specs=pl.BlockSpec((None, th * Wo, Cout), lambda n, t: (n, t, 0)),
        compiler_params=pltpu.CompilerParams(
            dimension_semantics=("parallel", "parallel"),
        ),
    )(*operands)

    return out.reshape(N, Ho, Wo, Cout)


@functools.partial(jax.jit, static_argnames=("stride",))
def identity_d_forward(x_nchw, w, b, *, stride):
    """Identity_D forward.  x_nchw: (N, Cin, H, W); w: (Cin, Cout); b: (Cout,).
    Matches nn.Sequential(AvgPool2d(3, stride, 1), Conv2d(Cin, Cout, 1))."""
    # One layout pass each way to honour the NCHW API; a model running NHWC
    # can call identity_d_forward_nhwc directly and both transposes disappear.
    x_nhwc = jnp.transpose(x_nchw, (0, 2, 3, 1))
    out_nhwc = identity_d_forward_nhwc(x_nhwc, w, b, stride)
    return jnp.transpose(out_nhwc, (0, 3, 1, 2))


# ----------------------------------------------------------------------------
# Pure-JAX reference (PyTorch semantics) for validation
# ----------------------------------------------------------------------------

def identity_d_reference(x_nchw, w, b, stride):
    win_sum = lax.reduce_window(
        x_nchw, 0.0, lax.add,
        window_dimensions=(1, 1, 3, 3),
        window_strides=(1, 1, stride, stride),
        padding=((0, 0), (0, 0), (1, 1), (1, 1)))
    pooled = win_sum / 9.0          # AvgPool2d default: count_include_pad=True
    y = jnp.einsum('nchw,cd->ndhw', pooled, w, precision=lax.Precision.HIGHEST)
    return y + b[None, :, None, None]


if __name__ == "__main__":
    key = jax.random.PRNGKey(0)
    k_x, k_w, k_b = jax.random.split(key, 3)

    # Identity_D(in_channels=64, expansion=4, stride=2) on a (2, 64, 16, 16) input.
    in_channels, expansion, stride = 64, 4, 2
    out_channels = in_channels * expansion

    x = jax.random.normal(k_x, (2, in_channels, 16, 16), jnp.float32)
    w = jax.random.normal(k_w, (in_channels, out_channels), jnp.float32) \
        * math.sqrt(1.0 / in_channels)
    b = jax.random.normal(k_b, (out_channels,), jnp.float32) * 0.01

    # stride=2 (downsampling identity path)
    out = jax.block_until_ready(identity_d_forward(x, w, b, stride=stride))
    assert out.shape == (2, out_channels, 8, 8), out.shape
    ref = identity_d_reference(x, w, b, stride)
    assert bool(jnp.all(jnp.isfinite(out)))
    err = float(jnp.max(jnp.abs(out - ref)))
    assert jnp.allclose(out, ref, rtol=5e-2, atol=5e-2), err

    # stride=1 path
    out1 = jax.block_until_ready(identity_d_forward(x, w, b, stride=1))
    assert out1.shape == (2, out_channels, 16, 16), out1.shape
    ref1 = identity_d_reference(x, w, b, 1)
    err1 = float(jnp.max(jnp.abs(out1 - ref1)))
    assert jnp.allclose(out1, ref1, rtol=5e-2, atol=5e-2), err1

    print("KERNEL_OK")
</pallas_src>

<mosaic_0001>
module attributes {stable_mosaic.version = 11 : i64} {
  func.func @_identity_d_kernel(%arg0: i32, %arg1: i32, %arg2: memref<1x4x2x8x128xbf16, #tpu.memory_space<vmem>>, %arg3: memref<1x1x1x8x128xbf16, #tpu.memory_space<vmem>>, %arg4: memref<128x256xbf16, #tpu.memory_space<vmem>>, %arg5: memref<1x256xf32, #tpu.memory_space<vmem>>, %arg6: memref<1x32x256xf32, #tpu.memory_space<vmem>>) attributes {dimension_semantics = [#tpu.dimension_semantics<parallel>, #tpu.dimension_semantics<parallel>], iteration_bounds = array<i64: 2, 2>, scalar_prefetch = 0 : i64, scratch_operands = 0 : i64, tpu.core_type = #tpu.core_type<tc>, window_params = [{transform_indices = @transform_0, window_bounds = array<i64: 1, 4, 2, 8, 128>}, {transform_indices = @transform_1, window_bounds = array<i64: 1, 1, 1, 8, 128>}, {pipeline_mode = #tpu.pipeline_mode<synchronous>, transform_indices = @transform_2, window_bounds = array<i64: 128, 256>}, {pipeline_mode = #tpu.pipeline_mode<synchronous>, transform_indices = @transform_3, window_bounds = array<i64: 1, 256>}, {transform_indices = @transform_4, window_bounds = array<i64: 1, 32, 256>}]} {
    %c0 = arith.constant 0 : index
    %c0_0 = arith.constant 0 : index
    %c0_1 = arith.constant 0 : index
    %c0_2 = arith.constant 0 : index
    %c0_3 = arith.constant 0 : index
    %0 = vector.load %arg2[%c0, %c0_0, %c0_1, %c0_2, %c0_3] : memref<1x4x2x8x128xbf16, #tpu.memory_space<vmem>>, vector<1x4x1x8x128xbf16>
    %1 = vector.shape_cast %0 : vector<1x4x1x8x128xbf16> to vector<4x8x128xbf16>
    %2 = arith.extf %1 : vector<4x8x128xbf16> to vector<4x8x128xf32>
    %c0_4 = arith.constant 0 : index
    %c0_5 = arith.constant 0 : index
    %c1 = arith.constant 1 : index
    %c0_6 = arith.constant 0 : index
    %c0_7 = arith.constant 0 : index
    %3 = vector.load %arg2[%c0_4, %c0_5, %c1, %c0_6, %c0_7] : memref<1x4x2x8x128xbf16, #tpu.memory_space<vmem>>, vector<1x4x1x8x128xbf16>
    %4 = vector.shape_cast %3 : vector<1x4x1x8x128xbf16> to vector<4x8x128xbf16>
    %5 = arith.extf %4 : vector<4x8x128xbf16> to vector<4x8x128xf32>
    %c0_i32 = arith.constant 0 : i32
    %6 = arith.cmpi eq, %arg1, %c0_i32 : i32
    %c0_8 = arith.constant 0 : index
    %c0_9 = arith.constant 0 : index
    %c0_10 = arith.constant 0 : index
    %c0_11 = arith.constant 0 : index
    %c0_12 = arith.constant 0 : index
    %7 = vector.load %arg3[%c0_8, %c0_9, %c0_10, %c0_11, %c0_12] : memref<1x1x1x8x128xbf16, #tpu.memory_space<vmem>>, vector<1x1x1x8x128xbf16>
    %8 = vector.shape_cast %7 : vector<1x1x1x8x128xbf16> to vector<1x8x128xbf16>
    %9 = arith.extf %8 : vector<1x8x128xbf16> to vector<1x8x128xf32>
    %cst = arith.constant 0.000000e+00 : f32
    %10 = vector.broadcast %cst : f32 to vector<1x8x128xf32>
    %11 = arith.select %6, %10, %9 : vector<1x8x128xf32>
    %12 = vector.extract_strided_slice %5 {offsets = [0, 0, 0], sizes = [3, 8, 128], strides = [1, 1, 1]} : vector<4x8x128xf32> to vector<3x8x128xf32>
    %13 = tpu.concatenate %11, %12 in 0 : vector<1x8x128xf32>, vector<3x8x128xf32> -> vector<4x8x128xf32>
    %14 = arith.addf %2, %5 : vector<4x8x128xf32>
    %15 = arith.addf %14, %13 : vector<4x8x128xf32>
    %16 = tpu.iota {dimensions = array<i32: 1>} : vector<4x8x128xi32>
    %17 = tpu.iota {dimensions = array<i32: 2>} : vector<4x8x128xi32>
    %c1_i32 = arith.constant 1 : i32
    %18 = tpu.dynamic_rotate %15 by %c1_i32 dim 1 : vector<4x8x128xf32>, i32 -> vector<4x8x128xf32>
    %c0_i32_13 = arith.constant 0 : i32
    %19 = vector.broadcast %c0_i32_13 : i32 to vector<4x8x128xi32>
    %20 = arith.cmpi sgt, %16, %19 : vector<4x8x128xi32>
    %c64_i32 = arith.constant 64 : i32
    %21 = vector.broadcast %c64_i32 : i32 to vector<4x8x128xi32>
    %22 = arith.cmpi sge, %17, %21 : vector<4x8x128xi32>
    %23 = arith.andi %20, %22 : vector<4x8x128xi1>
    %cst_14 = arith.constant 0.000000e+00 : f32
    %24 = vector.broadcast %cst_14 : f32 to vector<4x8x128xf32>
    %25 = arith.select %23, %18, %24 : vector<4x8x128xi1>, vector<4x8x128xf32>
    %26 = arith.addf %15, %25 : vector<4x8x128xf32>
    %27 = vector.shape_cast %26 : vector<4x8x128xf32> to vector<32x128xf32>
    %28 = arith.truncf %27 : vector<32x128xf32> to vector<32x128xbf16>
    %c0_15 = arith.constant 0 : index
    %c0_16 = arith.constant 0 : index
    %29 = vector.load %arg4[%c0_15, %c0_16] : memref<128x256xbf16, #tpu.memory_space<vmem>>, vector<128x256xbf16>
    %cst_17 = arith.constant dense<0.000000e+00> : vector<32x256xf32>
    %30 = tpu.matmul %28, %29, %cst_17 {dimension_numbers = #tpu.dot_dimension_numbers<[1], [0], [0], [1], [0, 0, 1, 1], [], []>} : vector<32x128xbf16>, vector<128x256xbf16>, vector<32x256xf32> -> vector<32x256xf32>
    %c0_18 = arith.constant 0 : index
    %c0_19 = arith.constant 0 : index
    %31 = vector.load %arg5[%c0_18, %c0_19] : memref<1x256xf32, #tpu.memory_space<vmem>>, vector<1x256xf32>
    %32 = vector.broadcast %31 : vector<1x256xf32> to vector<32x256xf32>
    %33 = arith.addf %30, %32 : vector<32x256xf32>
    %c0_20 = arith.constant 0 : index
    %c0_21 = arith.constant 0 : index
    %c0_22 = arith.constant 0 : index
    %34 = vector.load %arg6[%c0_20, %c0_21, %c0_22] : memref<1x32x256xf32, #tpu.memory_space<vmem>>, vector<1x32x256xf32>
    %35 = vector.shape_cast %34 : vector<1x32x256xf32> to vector<32x256xf32>
    %36 = vector.shape_cast %33 : vector<32x256xf32> to vector<1x32x256xf32>
    tpu.vector_store %arg6[%c0_20, %c0_21, %c0_22], %36 {strides = array<i32>} : memref<1x32x256xf32, #tpu.memory_space<vmem>>, vector<1x32x256xf32>,
    return
  }
  func.func @transform_0(%arg0: i32, %arg1: i32) -> (i32, i32, i32, i32, i32) {
    %c0_i32 = arith.constant 0 : i32
    %c0_i32_0 = arith.constant 0 : i32
    %c0_i32_1 = arith.constant 0 : i32
    %c0_i32_2 = arith.constant 0 : i32
    return %arg0, %arg1, %c0_i32, %c0_i32_0, %c0_i32_1 : i32, i32, i32, i32, i32
  }
  func.func @transform_1(%arg0: i32, %arg1: i32) -> (i32, i32, i32, i32, i32) {
    %c4_i32 = arith.constant 4 : i32
    %0 = arith.muli %arg1, %c4_i32 : i32
    %c1_i32 = arith.constant 1 : i32
    %1 = arith.subi %0, %c1_i32 : i32
    %c0_i32 = arith.constant 0 : i32
    %2 = arith.maxsi %1, %c0_i32 : i32
    %c1_i32_0 = arith.constant 1 : i32
    %c0_i32_1 = arith.constant 0 : i32
    %c0_i32_2 = arith.constant 0 : i32
    %c0_i32_3 = arith.constant 0 : i32
    return %arg0, %2, %c1_i32_0, %c0_i32_1, %c0_i32_2 : i32, i32, i32, i32, i32
  }
  func.func @transform_2(%arg0: i32, %arg1: i32) -> (i32, i32) {
    %c0_i32 = arith.constant 0 : i32
    %c0_i32_0 = arith.constant 0 : i32
    %c0_i32_1 = arith.constant 0 : i32
    return %c0_i32, %c0_i32_0 : i32, i32
  }
  func.func @transform_3(%arg0: i32, %arg1: i32) -> (i32, i32) {
    %c0_i32 = arith.constant 0 : i32
    %c0_i32_0 = arith.constant 0 : i32
    %c0_i32_1 = arith.constant 0 : i32
    return %c0_i32, %c0_i32_0 : i32, i32
  }
  func.func @transform_4(%arg0: i32, %arg1: i32) -> (i32, i32, i32) {
    %c0_i32 = arith.constant 0 : i32
    %c0_i32_0 = arith.constant 0 : i32
    return %arg0, %arg1, %c0_i32 : i32, i32, i32
  }
}

</mosaic_0001>

<bundles_post_ra>
// kernel: identity_d_forward.1
= control target key start
LH: loop header
LB: loop body
LE: loop exit
PB: predicated region body
PF: predicated region fallthrough
CT: control target
= control target key end

     0   :  { %9 = vsyncpa [#allocation3], 0  ;;  %s1163_s0 = inlined_call_operand.vmem [shape: bf16[2,8,2,8,128], index: 0, kind: input, shape index: {}, may-alias: {0,1}]   ;;  %s1164_s1 = inlined_call_operand.vmem [shape: bf16[2,8,2,8,128], index: 1, kind: input, shape index: {}, may-alias: {0,1}]   ;;  %s1165_s2 = inlined_call_operand.vmem [shape: bf16[128,256], index: 2, kind: input, shape index: {}]   ;;  %s1166_s3 = inlined_call_operand.vmem [shape: f32[1,256], index: 3, kind: input, shape index: {}]   ;;  %s1167_s4 = inlined_call_operand.hbm [shape: f32[2,64,256], index: 4, kind: output, shape index: {}]  }
   0x1   :  { %11 = vsyncpa [#allocation3 + $0x1], 0  ;;  %s938_s15 = smov 0   ;;  %s940_s16 = smov 0  }
   0x2   :  { %s942_s17 = smov 0   ;;  %s944_s18 = smov 0  }
   0x3   :  { %s946_s19 = smov 0   ;;  %s948_s20 = smov 0  }
   0x4   :  { %s950_s21 = smov 0   ;;  %s952_s22 = smov 0  }
   0x5 LB: > { %s644_s23 = sadd.s32 4294967295, %s907_s22   ;;  %s645_s24 = sadd.s32 4294967294, %s907_s22   ;;  %s907_s22 = sphi %s952_s22, %s17_s22   ;;  %s903_s21 = sphi %s950_s21, %s1179_s21   ;;  %s899_s20 = sphi %s948_s20, %s1178_s20   ;;  %s895_s19 = sphi %s946_s19, %s1177_s19   ;;  %s891_s18 = sphi %s944_s18, %s1176_s18   ;;  %s887_s17 = sphi %s942_s17, %s1175_s17   ;;  %s883_s16 = sphi %s940_s16, %s1174_s16   ;;  %s879_s15 = sphi %s938_s15, %s1173_s15  }
   0x6   : > { %s26_s25 = sadd.s32 1, %s899_s20  ;;  %s29_s26 = sadd.s32 1, %s903_s21 }
   0x7   : > { %p27_p0 = scmp.ge.s32.totalorder %s26_s25, 2  ;;  %p154_p1 = scmp.ne.s32.totalorder %s887_s17, %s883_s16 }
   0x8   : > { %p155_p2 = scmp.eq.s32.totalorder %s644_s23, 3  ;;  %p160_p5 = scmp.ne.s32.totalorder %s883_s16, %s879_s15 }
   0x9   : > { %s1181_s25 = smov (%p27_p0, %s26_s25), 0  ;;  %s1183_s26 = smov (!%p27_p0, %s29_s26), %s903_s21 }
   0xa   : > { %s140_s27 = ssub.s32 %s899_s20, %s1181_s25  ;;  %p989_p3 = por %p155_p2, %p154_p1 }
   0xb   : > { %p31_p4 = scmp.ge.s32.totalorder %s1183_s26, 2  ;;  %p161_p6 = scmp.eq.s32.totalorder %s645_s24, 3 }
   0xc   : > { %p652_p7 = scmp.ge.s32.totalorder %s907_s22, 1  ;;  %p220_p9 = scmp.lt.s32.totalorder %s907_s22, 5 }
   0xd   : > { %s1185_s26 = smov (%p31_p4, %s1183_s26), 0  ;;  %p998_p8 = por %p161_p6, %p160_p5 }
   0xe   : > { %1170 = sst [smem:[#allocation5_spill]] %s1185_s26  ;;  %s139_s30 = ssub.s32 %s903_s21, %s1185_s26 }
   0xf   : > { %s144_s5 = sadd.s32 1, %s887_s17  ;;  %s141_s6 = sor.u32 %s140_s27, %s139_s30 }
  0x10   : > { %p221_p10 = pnand %p652_p7, %p220_p9  ;;  %p142_p11 = scmp.eq.s32.totalorder %s141_s6, 0 }
  0x11   : > { %v789_v0 = vld [vmem:[%s1165_s2 + $0x4] ss:$8 sps:$4 sm:$0xff] (!%p221_p10)   ;;  %s654_s10 = sshll.u32 (!%p221_p10), %s891_s18, 2  ;;  %v791_v1 = vld [vmem:[%s1165_s2] ss:$8 sps:$4 sm:$0xff] (!%p221_p10)   ;;  %v909_v2 = vmov (!%p221_p10), 0   ;;  %v328_v8 = vlaneseq (!%p221_p10) }
  0x12   : > { %s1007_s7 = scalar_select %p142_p11, %s887_s17, %s144_s5  }
  0x13   : > { %224 = sbr.rel (%p221_p10) target bundleno = 284 (0x11c), region = 36  ;;  %489 = vmatprep.mubr.bf16.mxu0 (!%p221_p10), %v909_v2  ;;  %499 = vmatprep.mubr.bf16.mxu1 (!%p221_p10), %v909_v2  ;;  %p266_p12 = scmp.lt.s32.totalorder (!%p221_p10), %s895_s19, 1  ;;  %v792_v3 = vld [vmem:[%s1165_s2 + $0x14] ss:$8 sps:$4 sm:$0xff] (!%p221_p10)   ;;  %v794_v4 = vld [vmem:[%s1165_s2 + $0x10] ss:$8 sps:$4 sm:$0xff] (!%p221_p10)  }
  0x14   : > { %p268_p13 = scmp.lt.s32.totalorder (!%p221_p10), %s654_s10, 7  ;;  %457 = vmatprep.subr.bf16.mxu0 (!%p221_p10), %v789_v0  ;;  %699 = vmatprep.subr.bf16.mxu1 (!%p221_p10), %v789_v0  ;;  %s1020_s23 = sadd.s32 (!%p221_p10), 4294967295, %s654_s10  ;;  %v795_v5 = vld [vmem:[%s1165_s2 + $0x24] ss:$8 sps:$4 sm:$0xff] (!%p221_p10)   ;;  %v797_v6 = vld [vmem:[%s1165_s2 + $0x20] ss:$8 sps:$4 sm:$0xff] (!%p221_p10)  }
  0x15   : > { %458 = vmatpush1.bf16.msra.mxu0 (!%p221_p10), %v791_v1  ;;  %707 = vmatpush1.bf16.msra.mxu1 (!%p221_p10), %v791_v1  ;;  %p278_p0 = scmp.gt.s32.totalorder (!%p221_p10), %s1020_s23, 0  ;;  %p660_p1 = scmp.lt.s32.totalorder (!%p221_p10), %s1020_s23, 7  ;;  %v798_v7 = vld [vmem:[%s1165_s2 + $0x34] ss:$8 sps:$4 sm:$0xff] (!%p221_p10)   ;;  %v800_v9 = vld [vmem:[%s1165_s2 + $0x30] ss:$8 sps:$4 sm:$0xff] (!%p221_p10)  }
  0x16   : > { %459 = vmatprep.subr.bf16.mxu0 (!%p221_p10), %v792_v3  ;;  %700 = vmatprep.subr.bf16.mxu1 (!%p221_p10), %v792_v3  ;;  %p313_p2 = scmp.eq.s32.totalorder (!%p221_p10), %s891_s18, 0  ;;  %v801_v14 = vld [vmem:[%s1165_s2 + $0x44] ss:$8 sps:$4 sm:$0xff] (!%p221_p10)   ;;  %v1059_v19 = vshrl.u32 (!%p221_p10), %v328_v8, 7  ;;  %v331_v20 = vand.u32 (!%p221_p10), 127, %v328_v8  ;;  %s910_s5 = smov (!%p221_p10), [#allocation2]  }
  0x17   : > { %v803_v26 = vld [vmem:[%s1165_s2 + $0x40] ss:$8 sps:$4 sm:$0xff] (!%p221_p10)   ;;  %v804_v30 = vld [vmem:[%s1165_s2 + $0x54] ss:$8 sps:$4 sm:$0xff] (!%p221_p10)   ;;  %v806_v36 = vld [vmem:[%s1165_s2 + $0x50] ss:$8 sps:$4 sm:$0xff] (!%p221_p10)  }
  0x18   : > { %vm336_vm0 = vcmp.gt.s32.totalorder (!%p221_p10), %v1059_v19, 0  ;;  %vm337_vm1 = vcmp.ge.s32.totalorder (!%p221_p10), %v331_v20, 64  ;;  %v807_v41 = vld [vmem:[%s1165_s2 + $0x64] ss:$8 sps:$4 sm:$0xff] (!%p221_p10)   ;;  %v809_v44 = vld [vmem:[%s1165_s2 + $0x60] ss:$8 sps:$4 sm:$0xff] (!%p221_p10)  }
  0x19   : > { %460 = vmatpush1.bf16.msra.mxu0 (!%p221_p10), %v794_v4  ;;  %708 = vmatpush1.bf16.msra.mxu1 (!%p221_p10), %v794_v4  ;;  %vm338_vm3 = vmand (!%p221_p10), %vm336_vm0, %vm337_vm1  ;;  %v810_v48 = vld [vmem:[%s1165_s2 + $0x74] ss:$8 sps:$4 sm:$0xff] (!%p221_p10)   ;;  %v812_v54 = vld [vmem:[%s1165_s2 + $0x70] ss:$8 sps:$4 sm:$0xff] (!%p221_p10)   ;;  %v369_v58 = vsub.s32 (!%p221_p10), 0, %v1059_v19  ;;  %v373_v60 = vsub.s32 (!%p221_p10), 1, %v1059_v19 }
  0x1a   : > { %s1026_s30 = scalar_select %p266_p12, %s895_s19, 1  ;;  %461 = vmatprep.subr.bf16.mxu0 %v795_v5  ;;  %701 = vmatprep.subr.bf16.mxu1 %v795_v5  ;;  %v365_v59 = vld [vmem:[%s1166_s3] sm:$0x3] }
  0x1b   : > { %s1187_s10 = smov (!%p268_p13, %s654_s10), 7  ;;  %v370_v61 = vrot.slane %v365_v59, %v369_v58  ;;  %v374_v62 = vrot.slane %v365_v59, %v373_v60  ;;  %s817_s11 = sshll.u32 %s910_s5, 4  ;;  %s818_s11 = int_to_ptr.vmem [resolvable:$false] %s817_s11 }
  0x1c   : > { %s656_s8 = sshll.u32 %s1026_s30, 4  ;;  %s655_s9 = sshll.u32 %s1187_s10, 1 }
  0x1d   : > { %s272_s13 = sadd.s32 %s656_s8, %s655_s9  ;;  %462 = vmatpush1.bf16.msra.mxu0 %v797_v6  ;;  %709 = vmatpush1.bf16.msra.mxu1 %v797_v6  ;;  %s692_s30 = sshll.u32 %s895_s19, 4 }
  0x1e   : > { %s657_s27 = sshll.u32 %s272_s13, 2  ;;  %463 = vmatprep.subr.bf16.mxu0 %v798_v7  ;;  %702 = vmatprep.subr.bf16.mxu1 %v798_v7 }
  0x1f   : > { %s274_s6 = scalar_lea.vmem %s1163_s0, %s657_s27 }
  0x20   : > { %s279_s9 = scalar_select %p278_p0, %s1020_s23, 0  ;;  %v296_v10 = vld [vmem:[%s274_s6] sm:$0xff]   ;;  %v297_v11 = vld [vmem:[%s274_s6 + $0x8] sm:$0xff]   ;;  %v298_v12 = vld [vmem:[%s274_s6 + $0x10] sm:$0xff]  }
  0x21   : > { %s1052_s12 = scalar_select %p313_p2, 1, 0  ;;  %v299_v13 = vld [vmem:[%s274_s6 + $0x18] sm:$0xff]   ;;  %v301_v15 = vunpack.c.l.bf16 %v297_v11  ;;  %v310_v16 = vunpack.c.h.bf16 %v297_v11  ;;  %v302_v17 = vunpack.c.l.bf16 %v298_v12  ;;  %v311_v21 = vunpack.c.h.bf16 %v298_v12  ;;  %464 = vmatpush1.bf16.msra.mxu0 %v800_v9  ;;  %710 = vmatpush1.bf16.msra.mxu1 %v800_v9 }
  0x22   : > { %s1189_s9 = smov (!%p660_p1, %s279_s9), 7  ;;  %v303_v18 = vunpack.c.l.bf16 %v299_v13  ;;  %v312_v22 = vunpack.c.h.bf16 %v299_v13  ;;  %v300_v23 = vunpack.c.l.bf16 %v296_v10  ;;  %v309_v24 = vunpack.c.h.bf16 %v296_v10  ;;  %465 = vmatprep.subr.bf16.mxu0 %v801_v14  ;;  %703 = vmatprep.subr.bf16.mxu1 %v801_v14 }
  0x23   : > { %s665_s26 = sshll.u32 %s1189_s9, 1  ;;  %v321_v25 = vadd.f32 %v310_v16, %v301_v15  ;;  %v317_v27 = vstv %s1052_s12  ;;  %v322_v28 = vadd.f32 %v311_v21, %v302_v17  ;;  %s819_s9 = scalar_lea.vmem %s818_s11, 2048 }
  0x24   : > { %s591_s27 = sadd.s32 %s665_s26, %s656_s8  ;;  %v323_v29 = vadd.f32 %v312_v22, %v303_v18  ;;  %vm318_vm2 = vcmp.eq.s32.totalorder %v317_v27, 1  ;;  %v320_v35 = vadd.f32 %v309_v24, %v300_v23 }
  0x25   : > { %s667_s6 = sshll.u32 %s591_s27, 2  ;;  %v325_v31 = vadd.f32 %v321_v25, %v309_v24  ;;  %v326_v32 = vadd.f32 %v322_v28, %v310_v16  ;;  %466 = vmatpush1.bf16.msra.mxu0 %v803_v26  ;;  %711 = vmatpush1.bf16.msra.mxu1 %v803_v26 }
  0x26   : > { %s593_s13 = scalar_lea.vmem %s1164_s1, %s667_s6  ;;  %v327_v33 = vadd.f32 %v323_v29, %v311_v21  ;;  %467 = vmatprep.subr.bf16.mxu0 %v804_v30  ;;  %704 = vmatprep.subr.bf16.mxu1 %v804_v30  ;;  %s262_s6 = sand.u32 1, %s883_s16  }
  0x27   : > { %v672_v34 = vld [vmem:[%s593_s13 + $0x4] sm:$0xf]  ;;  %v333_v38 = vrot.slane %v325_v31, 7  ;;  %v334_v39 = vrot.slane %v326_v32, 7  ;;  %s698_s13 = sshll.u32 %s891_s18, 3  ;;  %s653_s8 = sshll.u32 %s262_s6, 6 }
  0x28   : > { %v315_v37 = vunpack.c.l.bf16 %v672_v34  ;;  %v335_v40 = vrot.slane %v327_v33, 7  ;;  %s532_s12 = sadd.s32 %s698_s13, %s692_s30  ;;  %s264_s26 = scalar_lea.vmem [#allocation2], %s653_s8 }
  0x29   : > { %468 = vmatpush1.bf16.msra.mxu0 %v806_v36  ;;  %712 = vmatpush1.bf16.msra.mxu1 %v806_v36  ;;  %v340_v45 = vsel %vm338_vm3, %v333_v38, 0.0  ;;  %v341_v46 = vsel %vm338_vm3, %v334_v39, 0.0  ;;  %s693_s14 = sshll.u32 %s532_s12, 7  ;;  %s535_s24 = sshll.u32 %s264_s26, 4  ;;  %s1107_s24 = int_to_ptr.vmem [resolvable:$true] %s535_s24 }
  0x2a   : > { %v319_v42 = vsel %vm318_vm2, 0.0, %v315_v37  ;;  %v342_v47 = vsel %vm338_vm3, %v335_v40, 0.0  ;;  %469 = vmatprep.subr.bf16.mxu0 %v807_v41  ;;  %705 = vmatprep.subr.bf16.mxu1 %v807_v41  ;;  %v344_v51 = vadd.f32 %v340_v45, %v325_v31  ;;  %v345_v52 = vadd.f32 %v341_v46, %v326_v32  ;;  %s1105_s23 = scalar_lea.hbm %s1167_s4, %s693_s14  ;;  %s1111_s27 = scalar_lea.sflag [#allocation3], %s262_s6 }
  0x2b   : > { %v324_v43 = vadd.f32 %v320_v35, %v319_v42  ;;  %v346_v53 = vadd.f32 %v342_v47, %v327_v33  ;;  %s813_s10 = scalar_lea.vmem %s1107_s24, 1024  ;;  %p820_p7 = scmp.lt.s32.totalorder %s1107_s24, %s818_s11 }
  0x2c   : > { %p814_p4 = scmp.ne.s32.totalorder %s1107_s24, %s813_s10  ;;  %p821_p9 = scmp.lt.s32.totalorder %s819_s9, %s813_s10 }
  0x2d   : > { %v332_v49 = vrot.slane %v324_v43, 7  ;;  %470 = vmatpush1.bf16.msra.mxu0 %v809_v44  ;;  %713 = vmatpush1.bf16.msra.mxu1 %v809_v44  ;;  %v348_v57 = vpack.c.bf16 %v346_v53, %v345_v52 }
  0x2e   : > { %471 = vmatprep.subr.bf16.mxu0 %v810_v48  ;;  %706 = vmatprep.subr.bf16.mxu1 %v810_v48  ;;  %p815_p5 = pnand %p814_p4, %p989_p3  ;;  %p822_p10 = por %p821_p9, %p820_p7 }
  0x2f   : > { %v339_v50 = vsel %vm338_vm3, %v332_v49, 0.0 }
  0x30   : > { %v343_v55 = vadd.f32 %v339_v50, %v324_v43  ;;  %p816_p6 = pneg %p815_p5 }
  0x31   : > { %472 = vmatpush1.bf16.msra.mxu0 %v812_v54  ;;  %714 = vmatpush1.bf16.msra.mxu1 %v812_v54 }
  0x32   : > { %v347_v56 = vpack.c.bf16 %v344_v51, %v343_v55  ;;  %p823_p11 = pnand %p822_p10, %p816_p6 }
  0x34   : > { %490 = vmatmul.mubr.bf16.vlgmr.msra.gmra.mrb[0].mxu0 %v347_v56  ;;  %500 = vmatmul.mubr.bf16.vlgmr.msra.gmra.mrb[0].mxu1 %v348_v57 }
 0x107   : > { %v491_v63 = vpop.f32.mrb[0].mxu0  ;;  %v501_v0 = vpop.f32.mrb[0].mxu1 }
 0x108   : > { %v492_v1 = vadd.f32 %v491_v63, %v370_v61  ;;  %v502_v2 = vadd.f32 %v501_v0, %v370_v61  ;;  %v493_v3 = vpop.f32.mrb[1].mxu0  ;;  %v503_v4 = vpop.f32.mrb[1].mxu1 }
 0x109   : > { %v494_v5 = vadd.f32 %v493_v3, %v374_v62  ;;  %v504_v6 = vadd.f32 %v503_v4, %v374_v62  ;;  %v495_v7 = vpop.f32.mrb[2].mxu0  ;;  %v505_v8 = vpop.f32.mrb[2].mxu1 }
 0x10a   : > { %510 = vst [vmem:[%s264_s26] sm:$0xff] %v492_v1  ;;  %514 = vst [vmem:[%s264_s26 + $0x20] sm:$0xff] %v502_v2  ;;  %v496_v9 = vadd.f32 %v495_v7, %v370_v61  ;;  %v506_v10 = vadd.f32 %v505_v8, %v370_v61  ;;  %v497_v11 = vpop.f32.mrb[3].mxu0  ;;  %v507_v12 = vpop.f32.mrb[3].mxu1 }
 0x10b   : > { %511 = vst [vmem:[%s264_s26 + $0x8] sm:$0xff] %v494_v5  ;;  %515 = vst [vmem:[%s264_s26 + $0x28] sm:$0xff] %v504_v6  ;;  %v498_v13 = vadd.f32 %v497_v11, %v374_v62  ;;  %v508_v14 = vadd.f32 %v507_v12, %v374_v62 }
 0x10c   : > { %512 = vst [vmem:[%s264_s26 + $0x10] sm:$0xff] %v496_v9  ;;  %516 = vst [vmem:[%s264_s26 + $0x30] sm:$0xff] %v506_v10 }
 0x10d   : > { %513 = vst [vmem:[%s264_s26 + $0x18] sm:$0xff] %v498_v13  ;;  %517 = vst [vmem:[%s264_s26 + $0x38] sm:$0xff] %v508_v14 }
 0x10e   : > { %826 = shalt.err (!%p823_p11)
}
 0x10f   : > { %s827_s6 = scalar_lea.hbm %s1105_s23, 1024  ;;  %s831_s8 = scalar_lea.hbm %s1167_s4, 4096 }
 0x110   : > { %p828_p12 = scmp.ne.s32.totalorder %s1105_s23, %s827_s6  ;;  %p832_p1 = scmp.lt.u32.totalorder %s1105_s23, %s1167_s4 }
 0x111   : > { %p833_p2 = scmp.lt.u32.totalorder %s831_s8, %s827_s6  ;;  %p835_p5 = scmp.lt.u32.totalorder %s827_s6, %s1105_s23 }
 0x112   : > { %p829_p13 = pnand %p828_p12, %p989_p3 }
 0x113   : > { %p834_p4 = por %p833_p2, %p832_p1 }
 0x114   : > { %p830_p0 = pneg %p829_p13 }
 0x115   : > { %p836_p6 = por %p835_p5, %p834_p4 }
 0x117   : > { %p837_p7 = pnand %p836_p6, %p830_p0 }
 0x119   : > { %840 = shalt.err (!%p837_p7)
}
 0x11a   : > { %s911_s26 = smov 256   ;;  %s912_s18 = smov 16  }
 0x11b   : > { %715 = dma.vmem_to_hbm [thread:$0]  (%p989_p3), %s1107_s24, 1024, %s1105_s23, %s1111_s27, %s911_s26, %s911_s26, %s912_s18  }
 0x11c PF: > { %p721_p9 = scmp.ge.s32.totalorder %s907_s22, 2  ;;  %s550_s19 = sand.u32 1, %s879_s15  }
 0x11d   : > { %s551_s10 = scalar_lea.sflag [#allocation3], %s550_s19 }
 0x11e   : > { %p718_p10 = pnand %p721_p9, %p998_p8 }
 0x120   : > { %874 = dma.done.wait (!%p718_p10), %s551_s10, 1024  }
 0x121   : > { %876 = vsyncadd (!%p718_p10), %s551_s10, 4294966272  ;;  %s17_s22 = sadd.s32 1, %s907_s22   ;;  %s1172_s28 = sld [smem:[#allocation5_spill]] }
 0x122   : > { %p14_p11 = scmp.ge.s32.totalorder %s17_s22, 6   ;;  %s1173_s15 = smov %s883_s16 }
 0x123   : > { %s1174_s16 = smov %s887_s17  ;;  %s1175_s17 = smov %s1007_s7 }
 0x124   : > { %s1176_s18 = smov %s899_s20  ;;  %s1177_s19 = smov %s903_s21 }
 0x125   : > { %s1178_s20 = smov %s1181_s25  ;;  %16 = sbr.rel (!%p14_p11) target bundleno = 5 (0x5), region = 75 }
 0x127   : > { %s1179_s21 = smov %s1172_s28 }
 0x12c   :  { %556 = vsyncpa [#allocation3], 1 }
 0x12d   :  { %558 = vsyncpa [#allocation3 + $0x1], 1 }

</bundles_post_ra>
